<compile_context>
chip_gen: v7x
topology: tpu7x:2x2x1
jax: 0.10.0
libtpu: 0.0.40
codegen_flags: <defaults>
</compile_context>

<pallas_src>
import functools

import jax
import jax.numpy as jnp
from jax.experimental import pallas as pl
from jax.experimental.pallas import tpu as pltpu

_SUBLANE = 8


def _round_up(n, m):
    return ((n + m - 1) // m) * m


def _vmem_capacity_bytes():
    """Physical VMEM of the attached TPU generation (conservative fallback)."""
    try:
        info = pltpu.get_tpu_info()
        cap = int(getattr(info, "vmem_capacity_bytes", 0) or 0)
        if cap > 0:
            return cap
    except Exception:
        pass
    return 64 << 20  # v7x-sized: a safe lower bound for all generations


def _tile_vmem_bytes(tile, D, V, x_isz, w_isz, out_isz, weight_buffers):
    return (
        2 * tile * D * x_isz                           # double-buffered x tile
        + 2 * tile * V * out_isz                       # double-buffered out tile
        + 3 * tile * V * 4                             # f32 logits / z / exp(z)
        + weight_buffers * (D * V * w_isz + V * 4)     # resident weight + bias
    )


def _pick_tile_m(M, D, V, *, x_isz, w_isz, out_isz, weight_buffers,
                 vmem_budget, max_tile):
    """Largest row tile whose working set fits the per-generation budget."""
    tile = max_tile
    while tile > _SUBLANE:
        if _tile_vmem_bytes(tile, D, V, x_isz, w_isz, out_isz,
                            weight_buffers) <= vmem_budget:
            break
        tile //= 2
    tile = max(_SUBLANE, tile)
    # Don't pick a tile wildly larger than the rows we actually have.
    tile = min(tile, max(_SUBLANE, _round_up(M, _SUBLANE)))
    # v7x has 2 TensorCores: make sure the 'parallel' row grid has >= 2 steps
    # whenever possible so the second core does not idle (free on v5e/v6e).
    if M > _SUBLANE and pl.cdiv(M, tile) < 2:
        tile = _round_up(pl.cdiv(M, 2), _SUBLANE)
    return tile


def _fc_logsoftmax_kernel(x_ref, w_ref, b_ref, o_ref):
    # x_ref: (TM, D)   w_ref: (D, V)   b_ref: (1, V)   o_ref: (TM, V)
    logits = jnp.dot(x_ref[...], w_ref[...],
                     preferred_element_type=jnp.float32) + b_ref[...]
    # Numerically stable log_softmax over the last (lane) dim, kept in f32.
    m = jnp.max(logits, axis=-1, keepdims=True)
    z = logits - m
    lse = jnp.log(jnp.sum(jnp.exp(z), axis=-1, keepdims=True))
    o_ref[...] = (z - lse).astype(o_ref.dtype)
    # TODO(synk): for very large vocabularies (V >= ~4096) a chunked/online
    # log-softmax over V-chunks would bound the f32 intermediates; unnecessary
    # at these sizes.


def _resident_spec(shape, single_buffer):
    """BlockSpec for an operand that is identical for every grid step."""
    index_map = lambda *_: (0,) * len(shape)
    if single_buffer:
        try:
            # Constant index_map -> single buffer is enough; saves VMEM.
            return pl.BlockSpec(shape, index_map, pipeline_mode=pl.Buffered(1))
        except TypeError:  # BlockSpec without pipeline_mode support
            pass
    return pl.BlockSpec(shape, index_map)


@functools.partial(
    jax.jit, static_argnames=("tile_m", "single_buffer_weight", "compute_dtype"))
def _forward_impl(x, w, b, tile_m=None, single_buffer_weight=True,
                  compute_dtype=None):
    """x: (B, T, D), w: (D, V) (transposed vs PyTorch's (V, D)), b: (V,).
    Returns (B, T, V) log-probs in x's dtype."""
    B, T, D = x.shape
    V = w.shape[1]
    M = B * T
    out_dtype = x.dtype

    if compute_dtype is not None:
        x = x.astype(compute_dtype)
        w = w.astype(compute_dtype)
    b2 = b.astype(jnp.float32).reshape(1, V)

    x2 = x.reshape(M, D)  # contiguous reshape: free, no HBM copy
    x_isz = x2.dtype.itemsize
    w_isz = w.dtype.itemsize
    out_isz = out_dtype.itemsize
    weight_buffers = 1 if single_buffer_weight else 2

    cap = _vmem_capacity_bytes()
    budget = (cap * 3) // 4                    # ~96 MiB v5e/v6e, ~48 MiB v7x
    max_tile = 2048 if budget >= (64 << 20) else 1024

    if tile_m is None:
        tm = _pick_tile_m(M, D, V, x_isz=x_isz, w_isz=w_isz, out_isz=out_isz,
                          weight_buffers=weight_buffers,
                          vmem_budget=budget, max_tile=max_tile)
    else:
        # Caller-supplied tile: round to the sublane multiple the BlockSpec needs.
        tm = max(_SUBLANE, _round_up(int(tile_m), _SUBLANE))

    grid = (pl.cdiv(M, tm),)  # ragged last block handled by Pallas

    need = _tile_vmem_bytes(tm, D, V, x_isz, w_isz, out_isz, weight_buffers)
    vmem_limit = int(min(max(need + (8 << 20), 32 << 20), (cap * 9) // 10))

    cost = pl.CostEstimate(
        flops=2 * M * D * V + 5 * M * V,
        transcendentals=M * (V + 1),
        bytes_accessed=(M * D * x_isz + D * V * w_isz + V * 4
                        + M * V * out_isz),
    )

    out = pl.pallas_call(
        _fc_logsoftmax_kernel,
        out_shape=jax.ShapeDtypeStruct((M, V), out_dtype),
        grid_spec=pltpu.PrefetchScalarGridSpec(
            num_scalar_prefetch=0,
            grid=grid,
            in_specs=[
                pl.BlockSpec((tm, D), lambda i: (i, 0)),
                _resident_spec((D, V), single_buffer_weight),
                _resident_spec((1, V), single_buffer_weight),
            ],
            out_specs=pl.BlockSpec((tm, V), lambda i: (i, 0)),
        ),
        compiler_params=pltpu.CompilerParams(
            dimension_semantics=("parallel",),
            vmem_limit_bytes=vmem_limit,
        ),
        cost_estimate=cost,
    )(x2, w, b2)

    return out.reshape(B, T, V)


_SINGLE_BUFFER_OK = None  # cached: does this Pallas build accept Buffered(1)?


def phoneme_ctc_decoder_forward(x, w, b, tile_m=None, compute_dtype=None):
    """PhonemeCTCdecoder.forward: log_softmax(x @ w + b, axis=-1)."""
    global _SINGLE_BUFFER_OK
    if _SINGLE_BUFFER_OK is None:
        try:
            out = _forward_impl(x, w, b, tile_m=tile_m,
                                single_buffer_weight=True,
                                compute_dtype=compute_dtype)
            jax.block_until_ready(out)
            _SINGLE_BUFFER_OK = True
            return out
        except Exception:
            _SINGLE_BUFFER_OK = False  # fall back to default double buffering
    return _forward_impl(x, w, b, tile_m=tile_m,
                         single_buffer_weight=_SINGLE_BUFFER_OK,
                         compute_dtype=compute_dtype)


def _reference(x, w, b):
    logits = jnp.einsum("btd,dv->btv", x, w) + b
    return jax.nn.log_softmax(logits, axis=-1)


if __name__ == "__main__":
    # Small shapes consistent with the module: (batch, num_steps, idims).
    B, T, idims, char_list_len = 2, 8, 32, 16

    key = jax.random.PRNGKey(0)
    kx, kw, kb, kp, kw2, kb2, kx2 = jax.random.split(key, 7)

    x = jax.random.normal(kx, (B, T, idims), dtype=jnp.float32)

    # Deterministic nn.Linear-style init: U(-1/sqrt(idims), 1/sqrt(idims)).
    # PyTorch stores weight as (V, D); the kernel layout is (D, V).
    bound = 1.0 / (idims ** 0.5)
    w = jax.random.uniform(kw, (idims, char_list_len), minval=-bound,
                           maxval=bound, dtype=jnp.float32)
    b = jax.random.uniform(kb, (char_list_len,), minval=-bound, maxval=bound,
                           dtype=jnp.float32)

    # Decode-path tables from __init__ (unused by forward), built for
    # completeness with the PyTorch semantics:
    #   mask_inf = p2g*1.0; mask_inf[==0] = -(finfo(fp16).min)**2; [==1] = 0
    phoneme_vocab = 8
    p2g = (jax.random.uniform(kp, (phoneme_vocab, char_list_len)) > 0.5
           ).astype(jnp.float32)
    logzero = -(float(jnp.finfo(jnp.float16).min) ** 2)  # == -(-65504)^2
    mask_inf = jnp.where(p2g == 1.0, 0.0, logzero)
    _ = mask_inf  # TODO(synk): only used by the beam-search decode path.

    out = phoneme_ctc_decoder_forward(x, w, b)
    jax.block_until_ready(out)
    ref = _reference(x, w, b)
    assert out.shape == (B, T, char_list_len)
    assert jnp.allclose(out, ref, atol=1e-5, rtol=1e-5)

    # Ragged row count (B*T not a multiple of the row tile).
    B2, T2 = 3, 37
    xr = jax.random.normal(kx2, (B2, T2, idims), dtype=jnp.float32)
    outr = phoneme_ctc_decoder_forward(xr, w, b)
    jax.block_until_ready(outr)
    assert outr.shape == (B2, T2, char_list_len)
    assert jnp.allclose(outr, _reference(xr, w, b), atol=1e-5, rtol=1e-5)

    # Vocab that is neither tiny nor a multiple of 128 (masked tail stores,
    # no pad / slice copies).
    V3 = 200
    w3 = jax.random.uniform(kw2, (idims, V3), minval=-bound, maxval=bound,
                            dtype=jnp.float32)
    b3 = jax.random.uniform(kb2, (V3,), minval=-bound, maxval=bound,
                            dtype=jnp.float32)
    x3 = jax.random.normal(kx, (4, 64, idims), dtype=jnp.float32)
    out3 = phoneme_ctc_decoder_forward(x3, w3, b3)
    jax.block_until_ready(out3)
    assert out3.shape == (4, 64, V3)
    assert jnp.allclose(out3, _reference(x3, w3, b3), atol=1e-5, rtol=1e-5)

    # Optional bf16 matmul path (f32 accumulate / softmax / output).
    out_bf16 = phoneme_ctc_decoder_forward(x, w, b, compute_dtype=jnp.bfloat16)
    jax.block_until_ready(out_bf16)
    assert out_bf16.shape == (B, T, char_list_len)
    assert bool(jnp.all(jnp.isfinite(out_bf16)))
    assert jnp.allclose(out_bf16, ref, atol=1e-1, rtol=1e-1)

    print("KERNEL_OK")
</pallas_src>

<mosaic_0001>
module attributes {stable_mosaic.version = 11 : i64} {
  func.func @_fc_logsoftmax_kernel(%arg0: i32, %arg1: memref<8x32xf32, #tpu.memory_space<vmem>>, %arg2: memref<32x16xf32, #tpu.memory_space<vmem>>, %arg3: memref<1x16xf32, #tpu.memory_space<vmem>>, %arg4: memref<8x16xf32, #tpu.memory_space<vmem>>) attributes {dimension_semantics = [#tpu.dimension_semantics<parallel>], iteration_bounds = array<i64: 2>, scalar_prefetch = 0 : i64, scratch_operands = 0 : i64, tpu.core_type = #tpu.core_type<tc>, window_params = [{transform_indices = @transform_0, window_bounds = array<i64: 8, 32>}, {pipeline_mode = #tpu.pipeline_mode<synchronous>, transform_indices = @transform_1, window_bounds = array<i64: 32, 16>}, {pipeline_mode = #tpu.pipeline_mode<synchronous>, transform_indices = @transform_2, window_bounds = array<i64: 1, 16>}, {transform_indices = @transform_3, window_bounds = array<i64: 8, 16>}]} {
    %c0 = arith.constant 0 : index
    %c0_0 = arith.constant 0 : index
    %0 = vector.load %arg1[%c0, %c0_0] : memref<8x32xf32, #tpu.memory_space<vmem>>, vector<8x32xf32>
    %c0_1 = arith.constant 0 : index
    %c0_2 = arith.constant 0 : index
    %1 = vector.load %arg2[%c0_1, %c0_2] : memref<32x16xf32, #tpu.memory_space<vmem>>, vector<32x16xf32>
    %cst = arith.constant dense<0.000000e+00> : vector<8x16xf32>
    %2 = tpu.matmul %0, %1, %cst {dimension_numbers = #tpu.dot_dimension_numbers<[1], [0], [0], [1], [0, 0, 1, 1], [], []>} : vector<8x32xf32>, vector<32x16xf32>, vector<8x16xf32> -> vector<8x16xf32>
    %c0_3 = arith.constant 0 : index
    %c0_4 = arith.constant 0 : index
    %3 = vector.load %arg3[%c0_3, %c0_4] : memref<1x16xf32, #tpu.memory_space<vmem>>, vector<1x16xf32>
    %4 = vector.broadcast %3 : vector<1x16xf32> to vector<8x16xf32>
    %5 = arith.addf %2, %4 : vector<8x16xf32>
    %cst_5 = arith.constant dense<0xFF800000> : vector<8xf32>
    %6 = vector.multi_reduction <maximumf>, %5, %cst_5 [1] : vector<8x16xf32> to vector<8xf32>
    %7 = vector.shape_cast %6 : vector<8xf32> to vector<8x1xf32>
    %8 = vector.broadcast %7 : vector<8x1xf32> to vector<8x16xf32>
    %9 = arith.subf %5, %8 : vector<8x16xf32>
    %10 = math.exp %9 : vector<8x16xf32>
    %cst_6 = arith.constant dense<0.000000e+00> : vector<8xf32>
    %11 = vector.multi_reduction <add>, %10, %cst_6 [1] : vector<8x16xf32> to vector<8xf32>
    %12 = vector.shape_cast %11 : vector<8xf32> to vector<8x1xf32>
    %13 = math.log %12 : vector<8x1xf32>
    %14 = vector.broadcast %13 : vector<8x1xf32> to vector<8x16xf32>
    %15 = arith.subf %9, %14 : vector<8x16xf32>
    %c0_7 = arith.constant 0 : index
    %c0_8 = arith.constant 0 : index
    %16 = vector.load %arg4[%c0_7, %c0_8] : memref<8x16xf32, #tpu.memory_space<vmem>>, vector<8x16xf32>
    tpu.vector_store %arg4[%c0_7, %c0_8], %15 {strides = array<i32>} : memref<8x16xf32, #tpu.memory_space<vmem>>, vector<8x16xf32>,
    return
  }
  func.func @transform_0(%arg0: i32) -> (i32, i32) {
    %c0_i32 = arith.constant 0 : i32
    %c0_i32_0 = arith.constant 0 : i32
    return %arg0, %c0_i32 : i32, i32
  }
  func.func @transform_1(%arg0: i32) -> (i32, i32) {
    %c0_i32 = arith.constant 0 : i32
    %c0_i32_0 = arith.constant 0 : i32
    %c0_i32_1 = arith.constant 0 : i32
    return %c0_i32, %c0_i32_0 : i32, i32
  }
  func.func @transform_2(%arg0: i32) -> (i32, i32) {
    %c0_i32 = arith.constant 0 : i32
    %c0_i32_0 = arith.constant 0 : i32
    %c0_i32_1 = arith.constant 0 : i32
    return %c0_i32, %c0_i32_0 : i32, i32
  }
  func.func @transform_3(%arg0: i32) -> (i32, i32) {
    %c0_i32 = arith.constant 0 : i32
    %c0_i32_0 = arith.constant 0 : i32
    return %arg0, %c0_i32 : i32, i32
  }
}

module attributes {stable_mosaic.version = 11 : i64} {
  func.func @_fc_logsoftmax_kernel(%arg0: i32, %arg1: memref<8x32xf32, #tpu.memory_space<vmem>>, %arg2: memref<32x16xf32, #tpu.memory_space<vmem>>, %arg3: memref<1x16xf32, #tpu.memory_space<vmem>>, %arg4: memref<8x16xf32, #tpu.memory_space<vmem>>) attributes {dimension_semantics = [#tpu.dimension_semantics<parallel>], iteration_bounds = array<i64: 2>, scalar_prefetch = 0 : i64, scratch_operands = 0 : i64, tpu.core_type = #tpu.core_type<tc>, window_params = [{transform_indices = @transform_0, window_bounds = array<i64: 8, 32>}, {pipeline_mode = #tpu.pipeline_mode<synchronous>, transform_indices = @transform_1, window_bounds = array<i64: 32, 16>}, {pipeline_mode = #tpu.pipeline_mode<synchronous>, transform_indices = @transform_2, window_bounds = array<i64: 1, 16>}, {transform_indices = @transform_3, window_bounds = array<i64: 8, 16>}]} {
    %c0 = arith.constant 0 : index
    %c0_0 = arith.constant 0 : index
    %0 = vector.load %arg1[%c0, %c0_0] : memref<8x32xf32, #tpu.memory_space<vmem>>, vector<8x32xf32>
    %c0_1 = arith.constant 0 : index
    %c0_2 = arith.constant 0 : index
    %1 = vector.load %arg2[%c0_1, %c0_2] : memref<32x16xf32, #tpu.memory_space<vmem>>, vector<32x16xf32>
    %cst = arith.constant dense<0.000000e+00> : vector<8x16xf32>
    %2 = tpu.matmul %0, %1, %cst {dimension_numbers = #tpu.dot_dimension_numbers<[1], [0], [0], [1], [0, 0, 1, 1], [], []>} : vector<8x32xf32>, vector<32x16xf32>, vector<8x16xf32> -> vector<8x16xf32>
    %c0_3 = arith.constant 0 : index
    %c0_4 = arith.constant 0 : index
    %3 = vector.load %arg3[%c0_3, %c0_4] : memref<1x16xf32, #tpu.memory_space<vmem>>, vector<1x16xf32>
    %4 = vector.broadcast %3 : vector<1x16xf32> to vector<8x16xf32>
    %5 = arith.addf %2, %4 : vector<8x16xf32>
    %cst_5 = arith.constant dense<0xFF800000> : vector<8xf32>
    %6 = vector.multi_reduction <maximumf>, %5, %cst_5 [1] : vector<8x16xf32> to vector<8xf32>
    %7 = vector.shape_cast %6 : vector<8xf32> to vector<8x1xf32>
    %8 = vector.broadcast %7 : vector<8x1xf32> to vector<8x16xf32>
    %9 = arith.subf %5, %8 : vector<8x16xf32>
    %10 = math.exp %9 : vector<8x16xf32>
    %cst_6 = arith.constant dense<0.000000e+00> : vector<8xf32>
    %11 = vector.multi_reduction <add>, %10, %cst_6 [1] : vector<8x16xf32> to vector<8xf32>
    %12 = vector.shape_cast %11 : vector<8xf32> to vector<8x1xf32>
    %13 = math.log %12 : vector<8x1xf32>
    %14 = vector.broadcast %13 : vector<8x1xf32> to vector<8x16xf32>
    %15 = arith.subf %9, %14 : vector<8x16xf32>
    %c0_7 = arith.constant 0 : index
    %c0_8 = arith.constant 0 : index
    %16 = vector.load %arg4[%c0_7, %c0_8] : memref<8x16xf32, #tpu.memory_space<vmem>>, vector<8x16xf32>
    tpu.vector_store %arg4[%c0_7, %c0_8], %15 {strides = array<i32>} : memref<8x16xf32, #tpu.memory_space<vmem>>, vector<8x16xf32>,
    return
  }
  func.func @transform_0(%arg0: i32) -> (i32, i32) {
    %c0_i32 = arith.constant 0 : i32
    %c0_i32_0 = arith.constant 0 : i32
    return %arg0, %c0_i32 : i32, i32
  }
  func.func @transform_1(%arg0: i32) -> (i32, i32) {
    %c0_i32 = arith.constant 0 : i32
    %c0_i32_0 = arith.constant 0 : i32
    %c0_i32_1 = arith.constant 0 : i32
    return %c0_i32, %c0_i32_0 : i32, i32
  }
  func.func @transform_2(%arg0: i32) -> (i32, i32) {
    %c0_i32 = arith.constant 0 : i32
    %c0_i32_0 = arith.constant 0 : i32
    %c0_i32_1 = arith.constant 0 : i32
    return %c0_i32, %c0_i32_0 : i32, i32
  }
  func.func @transform_3(%arg0: i32) -> (i32, i32) {
    %c0_i32 = arith.constant 0 : i32
    %c0_i32_0 = arith.constant 0 : i32
    return %arg0, %c0_i32 : i32, i32
  }
}

</mosaic_0001>

<bundles_post_ra>
// kernel: _forward_impl.1
= control target key start
LH: loop header
LB: loop body
LE: loop exit
PB: predicated region body
PF: predicated region fallthrough
CT: control target
= control target key end

     0   :  { %8 = vsyncpa [#allocation3], 0  ;;  %s625_s0 = inlined_call_operand.vmem [shape: f32[16,32], index: 0, kind: input, shape index: {}]   ;;  %s626_s1 = inlined_call_operand.vmem [shape: f32[32,16], index: 1, kind: input, shape index: {}]   ;;  %s627_s2 = inlined_call_operand.vmem [shape: f32[1,16], index: 2, kind: input, shape index: {}]   ;;  %s628_s3 = inlined_call_operand.hbm [shape: f32[16,16], index: 3, kind: output, shape index: {}]  }
   0x1   :  { %10 = vsyncpa [#allocation3 + $0x1], 0  ;;  %s507_s12 = smov 0   ;;  %s509_s13 = smov 0  }
   0x2   :  { %s511_s14 = smov 0   ;;  %s513_s15 = smov 0  }
   0x3 LB: > { %s528_s16 = sadd.s32 4294967295, %s481_s15   ;;  %s339_s17 = sadd.s32 4294967294, %s481_s15   ;;  %s481_s15 = sphi %s513_s15, %s634_s15   ;;  %s477_s14 = sphi %s511_s14, %s633_s14   ;;  %s473_s13 = sphi %s509_s13, %s632_s13   ;;  %s469_s12 = sphi %s507_s12, %s631_s12  }
   0x4   : > { %s532_s18 = sadd.s32 1, %s481_s15   ;;  %s91_s19 = sadd.s32 1, %s477_s14 }
   0x5   : > { %s88_s20 = ssub.s32 %s481_s15, %s532_s18  ;;  %p101_p0 = scmp.ne.s32.totalorder %s477_s14, %s473_s13 }
   0x6   : > { %p89_p1 = scmp.eq.s32.totalorder %s88_s20, 0  ;;  %p102_p2 = scmp.eq.s32.totalorder %s528_s16, 1 }
   0x7   : > { %p107_p3 = scmp.ne.s32.totalorder %s473_s13, %s469_s12  ;;  %p108_p4 = scmp.eq.s32.totalorder %s339_s17, 1 }
   0x8   : > { %s543_s21 = scalar_select %p89_p1, %s477_s14, %s91_s19  }
   0x9   : > { %p545_p5 = por %p102_p2, %p101_p0  ;;  %p549_p6 = por %p108_p4, %p107_p3 }
   0xa   : > { %p342_p7 = scmp.ge.s32.totalorder %s481_s15, 1  ;;  %p139_p8 = scmp.lt.s32.totalorder %s481_s15, 3 }
   0xc   : > { %p140_p9 = pnand %p342_p7, %p139_p8 }
   0xd   : > { %v167_v0 = vld [vmem:[%s626_s1] sm:$0xff] (!%p140_p9)  ;;  %v168_v1 = vld [vmem:[%s626_s1 + $0x8] sm:$0xff] (!%p140_p9)  ;;  %v169_v2 = vld [vmem:[%s626_s1 + $0x10] sm:$0xff] (!%p140_p9)  ;;  %v483_v3 = vmov (!%p140_p9), 0.0|0.0   ;;  %vm484_vm0 = vmmov (!%p140_p9), 0   ;;  %v485_v6 = vmov (!%p140_p9), 0.0  }
   0xe   : > { %143 = sbr.rel (%p140_p9) target bundleno = 570 (0x23a), region = 32  ;;  %367 = vmatprep.subr.bf16.mxu0 (!%p140_p9), %v483_v3  ;;  %v368_v4 = vpack.c.bf16 (!%p140_p9), %v168_v1, %v167_v0  ;;  %v170_v5 = vld [vmem:[%s626_s1 + $0x18] sm:$0xff] (!%p140_p9)  ;;  %364 = vmatprep.mubr.msk.f32.mxu0 (!%p140_p9), %vm484_vm0, %v485_v6  ;;  %p162_p10 = scmp.lt.s32.totalorder (!%p140_p9), %s528_s16, 1  ;;  %vm178_vm1 = vcmask (!%p140_p9), 261120   ;;  %v345_v9 = vld [vmem:[%s627_s2] ss:$0 sm:$0xff] (!%p140_p9) }
   0xf   : > { %v371_v7 = vpack.c.bf16 (!%p140_p9), %v170_v5, %v169_v2  ;;  %vm252_vm2 = vcmask (!%p140_p9), 130048   ;;  %s159_s17 = sand.u32 (!%p140_p9), 1, %s473_s13   ;;  %s348_s20 = sshll.u32 (!%p140_p9), %s528_s16, 7 }
  0x10   : > { %369 = vmatpush3.bf16.msra.mxu0 (!%p140_p9), %v368_v4  ;;  %s343_s19 = sshll.u32 (!%p140_p9), %s159_s17, 3  ;;  %s582_s28 = scalar_lea.hbm (!%p140_p9), %s628_s3, %s348_s20 }
  0x11   : > { %370 = vmatprep.subr.bf16.mxu0 (!%p140_p9), %v483_v3  ;;  %s161_s24 = scalar_lea.vmem (!%p140_p9), [#allocation2], %s343_s19  ;;  %s267_s29 = scalar_lea.sflag (!%p140_p9), [#allocation3], %s159_s17 }
  0x12   : > { %s280_s25 = sshll.u32 (!%p140_p9), %s161_s24, 4  ;;  %s584_s25 = int_to_ptr.vmem [resolvable:$true] %s280_s25 }
  0x13   : > { %s419_s30 = scalar_lea.vmem (!%p140_p9), %s584_s25, 128 }
  0x14   : > { %372 = vmatpush3.bf16.msra.mxu0 (!%p140_p9), %v371_v7  ;;  %p420_p11 = scmp.ne.s32.totalorder (!%p140_p9), %s584_s25, %s419_s30 }
  0x15   : > { %s163_s5 = scalar_select %p162_p10, %s528_s16, 1 }
  0x16   : > { %p421_p12 = pnand %p420_p11, %p545_p5  ;;  %s486_s16 = smov [#allocation2]  }
  0x17   : > { %s344_s6 = sshll.u32 %s163_s5, 3  ;;  %s423_s4 = sshll.u32 %s486_s16, 4  ;;  %s424_s4 = int_to_ptr.vmem [resolvable:$false] %s423_s4 }
  0x18   : > { %s165_s9 = scalar_lea.vmem %s625_s0, %s344_s6  ;;  %p422_p13 = pneg %p421_p12 }
  0x19   : > { %v166_v8 = vld [vmem:[%s165_s9] sm:$0xff]  ;;  %s425_s5 = scalar_lea.vmem %s424_s4, 256  ;;  %p426_p0 = scmp.lt.s32.totalorder %s584_s25, %s424_s4 }
  0x1a   : > { %365 = vmatmul.mubr.msk.f32.vlgmr.msra.gmra.mrb[0].mxu0 %vm178_vm1, %v166_v8  ;;  %p427_p1 = scmp.lt.s32.totalorder %s425_s5, %s419_s30 }
  0x1c   : > { %p428_p2 = por %p427_p1, %p426_p0 }
  0x1e   : > { %p429_p3 = pnand %p428_p2, %p422_p13 }
  0xed   : > { %v248_v10 = vpop.f32.mrb[0].mxu0 }
  0xee   : > { %v249_v11 = vadd.f32 %v345_v9, %v248_v10  ;;  %v366_v12 = vpop.f32.mrb[1].mxu0 }
  0xf0   : > { %v253_v13 = vsel %vm252_vm2, %v249_v11, -inf }
  0xf1   : > { %254 = vmax.xlane.f32.xlu0 %v253_v13 }
 0x17e   : > { %v255_v14 = vpop.xlane.xlu0 %254 }
 0x17f   : > { %v256_v15 = vsub.f32 %v249_v11, %v255_v14 }
 0x181   : > { %v257_v16 = vmul.f32 1.442695, %v256_v15 }
 0x183   : > { %415 = vpow2.f32 %v257_v16 }
 0x18d   : > { %v416_v17 = vpop.eup %415 }
 0x18e   : > { %v259_v18 = vsel %vm252_vm2, %v416_v17, 0.0 }
 0x18f   : > { %260 = vadd.xlane.f32.xlu0 %v259_v18 }
 0x21c   : > { %v261_v19 = vpop.xlane.xlu0 %260 }
 0x21d   : > { %417 = vlog2.f32 %v261_v19 }
 0x227   : > { %v418_v20 = vpop.eup %417 }
 0x228   : > { %v263_v21 = vmul.f32 0.6931472, %v418_v20 }
 0x22a   : > { %v264_v22 = vsub.f32 %v256_v15, %v263_v21 }
 0x22c   : > { %265 = vst.msk [vmem:[%s161_s24] sm:$0xff] %vm252_vm2, %v264_v22 }
 0x22d   : > { %432 = shalt.err (!%p429_p3)
}
 0x22e   : > { %s433_s6 = scalar_lea.hbm %s582_s28, 128  ;;  %s437_s9 = scalar_lea.hbm %s628_s3, 256 }
 0x22f   : > { %p434_p4 = scmp.ne.s32.totalorder %s582_s28, %s433_s6  ;;  %p438_p9 = scmp.lt.u32.totalorder %s582_s28, %s628_s3 }
 0x230   : > { %p439_p10 = scmp.lt.u32.totalorder %s437_s9, %s433_s6  ;;  %p441_p12 = scmp.lt.u32.totalorder %s433_s6, %s582_s28 }
 0x231   : > { %p435_p7 = pnand %p434_p4, %p545_p5 }
 0x232   : > { %p440_p11 = por %p439_p10, %p438_p9 }
 0x233   : > { %p436_p8 = pneg %p435_p7 }
 0x234   : > { %p442_p13 = por %p441_p12, %p440_p11 }
 0x236   : > { %p443_p0 = pnand %p442_p13, %p436_p8 }
 0x238   : > { %446 = shalt.err (!%p443_p0)
}
 0x239   : > { %373 = dma.vmem_to_hbm [thread:$0]  (%p545_p5), %s584_s25, 128, %s582_s28, %s267_s29  }
 0x23a PF: > { %p379_p1 = scmp.ge.s32.totalorder %s481_s15, 2  ;;  %s292_s17 = sand.u32 1, %s469_s12  }
 0x23b   : > { %s293_s19 = scalar_lea.sflag [#allocation3], %s292_s17 }
 0x23c   : > { %p376_p2 = pnand %p379_p1, %p549_p6 }
 0x23e   : > { %464 = dma.done.wait (!%p376_p2), %s293_s19, 128  }
 0x23f   : > { %466 = vsyncadd (!%p376_p2), %s293_s19, 4294967168  ;;  %p13_p3 = scmp.ge.s32.totalorder %s532_s18, 4   ;;  %s631_s12 = smov %s473_s13 }
 0x240   : > { %s632_s13 = smov %s477_s14  ;;  %s633_s14 = smov %s543_s21 }
 0x241   : > { %s634_s15 = smov %s532_s18  ;;  %15 = sbr.rel (!%p13_p3) target bundleno = 3 (0x3), region = 67 }
 0x248   :  { %298 = vsyncpa [#allocation3], 1 }
 0x249   :  { %300 = vsyncpa [#allocation3 + $0x1], 1 }

// kernel: _forward_impl.1
= control target key start
LH: loop header
LB: loop body
LE: loop exit
PB: predicated region body
PF: predicated region fallthrough
CT: control target
= control target key end

     0   :  { %8 = vsyncpa [#allocation3], 0  ;;  %s625_s0 = inlined_call_operand.vmem [shape: f32[16,32], index: 0, kind: input, shape index: {}]   ;;  %s626_s1 = inlined_call_operand.vmem [shape: f32[32,16], index: 1, kind: input, shape index: {}]   ;;  %s627_s2 = inlined_call_operand.vmem [shape: f32[1,16], index: 2, kind: input, shape index: {}]   ;;  %s628_s3 = inlined_call_operand.hbm [shape: f32[16,16], index: 3, kind: output, shape index: {}]  }
   0x1   :  { %10 = vsyncpa [#allocation3 + $0x1], 0  ;;  %s507_s12 = smov 0   ;;  %s509_s13 = smov 0  }
   0x2   :  { %s511_s14 = smov 0   ;;  %s513_s15 = smov 0  }
   0x3 LB: > { %s528_s16 = sadd.s32 4294967295, %s481_s15   ;;  %s339_s17 = sadd.s32 4294967294, %s481_s15   ;;  %s481_s15 = sphi %s513_s15, %s634_s15   ;;  %s477_s14 = sphi %s511_s14, %s633_s14   ;;  %s473_s13 = sphi %s509_s13, %s632_s13   ;;  %s469_s12 = sphi %s507_s12, %s631_s12  }
   0x4   : > { %s532_s18 = sadd.s32 1, %s481_s15   ;;  %s91_s19 = sadd.s32 1, %s477_s14 }
   0x5   : > { %s88_s20 = ssub.s32 %s481_s15, %s532_s18  ;;  %p101_p0 = scmp.ne.s32.totalorder %s477_s14, %s473_s13 }
   0x6   : > { %p89_p1 = scmp.eq.s32.totalorder %s88_s20, 0  ;;  %p102_p2 = scmp.eq.s32.totalorder %s528_s16, 1 }
   0x7   : > { %p107_p3 = scmp.ne.s32.totalorder %s473_s13, %s469_s12  ;;  %p108_p4 = scmp.eq.s32.totalorder %s339_s17, 1 }
   0x8   : > { %s543_s21 = scalar_select %p89_p1, %s477_s14, %s91_s19  }
   0x9   : > { %p545_p5 = por %p102_p2, %p101_p0  ;;  %p549_p6 = por %p108_p4, %p107_p3 }
   0xa   : > { %p342_p7 = scmp.ge.s32.totalorder %s481_s15, 1  ;;  %p139_p8 = scmp.lt.s32.totalorder %s481_s15, 3 }
   0xc   : > { %p140_p9 = pnand %p342_p7, %p139_p8 }
   0xd   : > { %v167_v0 = vld [vmem:[%s626_s1] sm:$0xff] (!%p140_p9)  ;;  %v168_v1 = vld [vmem:[%s626_s1 + $0x8] sm:$0xff] (!%p140_p9)  ;;  %v169_v2 = vld [vmem:[%s626_s1 + $0x10] sm:$0xff] (!%p140_p9)  ;;  %v483_v3 = vmov (!%p140_p9), 0.0|0.0   ;;  %vm484_vm0 = vmmov (!%p140_p9), 0   ;;  %v485_v6 = vmov (!%p140_p9), 0.0  }
   0xe   : > { %143 = sbr.rel (%p140_p9) target bundleno = 570 (0x23a), region = 32  ;;  %367 = vmatprep.subr.bf16.mxu0 (!%p140_p9), %v483_v3  ;;  %v368_v4 = vpack.c.bf16 (!%p140_p9), %v168_v1, %v167_v0  ;;  %v170_v5 = vld [vmem:[%s626_s1 + $0x18] sm:$0xff] (!%p140_p9)  ;;  %364 = vmatprep.mubr.msk.f32.mxu0 (!%p140_p9), %vm484_vm0, %v485_v6  ;;  %p162_p10 = scmp.lt.s32.totalorder (!%p140_p9), %s528_s16, 1  ;;  %vm178_vm1 = vcmask (!%p140_p9), 261120   ;;  %v345_v9 = vld [vmem:[%s627_s2] ss:$0 sm:$0xff] (!%p140_p9) }
   0xf   : > { %v371_v7 = vpack.c.bf16 (!%p140_p9), %v170_v5, %v169_v2  ;;  %vm252_vm2 = vcmask (!%p140_p9), 130048   ;;  %s159_s17 = sand.u32 (!%p140_p9), 1, %s473_s13   ;;  %s348_s20 = sshll.u32 (!%p140_p9), %s528_s16, 7 }
  0x10   : > { %369 = vmatpush3.bf16.msra.mxu0 (!%p140_p9), %v368_v4  ;;  %s343_s19 = sshll.u32 (!%p140_p9), %s159_s17, 3  ;;  %s582_s28 = scalar_lea.hbm (!%p140_p9), %s628_s3, %s348_s20 }
  0x11   : > { %370 = vmatprep.subr.bf16.mxu0 (!%p140_p9), %v483_v3  ;;  %s161_s24 = scalar_lea.vmem (!%p140_p9), [#allocation2], %s343_s19  ;;  %s267_s29 = scalar_lea.sflag (!%p140_p9), [#allocation3], %s159_s17 }
  0x12   : > { %s280_s25 = sshll.u32 (!%p140_p9), %s161_s24, 4  ;;  %s584_s25 = int_to_ptr.vmem [resolvable:$true] %s280_s25 }
  0x13   : > { %s419_s30 = scalar_lea.vmem (!%p140_p9), %s584_s25, 128 }
  0x14   : > { %372 = vmatpush3.bf16.msra.mxu0 (!%p140_p9), %v371_v7  ;;  %p420_p11 = scmp.ne.s32.totalorder (!%p140_p9), %s584_s25, %s419_s30 }
  0x15   : > { %s163_s5 = scalar_select %p162_p10, %s528_s16, 1 }
  0x16   : > { %p421_p12 = pnand %p420_p11, %p545_p5  ;;  %s486_s16 = smov [#allocation2]  }
  0x17   : > { %s344_s6 = sshll.u32 %s163_s5, 3  ;;  %s423_s4 = sshll.u32 %s486_s16, 4  ;;  %s424_s4 = int_to_ptr.vmem [resolvable:$false] %s423_s4 }
  0x18   : > { %s165_s9 = scalar_lea.vmem %s625_s0, %s344_s6  ;;  %p422_p13 = pneg %p421_p12 }
  0x19   : > { %v166_v8 = vld [vmem:[%s165_s9] sm:$0xff]  ;;  %s425_s5 = scalar_lea.vmem %s424_s4, 256  ;;  %p426_p0 = scmp.lt.s32.totalorder %s584_s25, %s424_s4 }
  0x1a   : > { %365 = vmatmul.mubr.msk.f32.vlgmr.msra.gmra.mrb[0].mxu0 %vm178_vm1, %v166_v8  ;;  %p427_p1 = scmp.lt.s32.totalorder %s425_s5, %s419_s30 }
  0x1c   : > { %p428_p2 = por %p427_p1, %p426_p0 }
  0x1e   : > { %p429_p3 = pnand %p428_p2, %p422_p13 }
  0xed   : > { %v248_v10 = vpop.f32.mrb[0].mxu0 }
  0xee   : > { %v249_v11 = vadd.f32 %v345_v9, %v248_v10  ;;  %v366_v12 = vpop.f32.mrb[1].mxu0 }
  0xf0   : > { %v253_v13 = vsel %vm252_vm2, %v249_v11, -inf }
  0xf1   : > { %254 = vmax.xlane.f32.xlu0 %v253_v13 }
 0x17e   : > { %v255_v14 = vpop.xlane.xlu0 %254 }
 0x17f   : > { %v256_v15 = vsub.f32 %v249_v11, %v255_v14 }
 0x181   : > { %v257_v16 = vmul.f32 1.442695, %v256_v15 }
 0x183   : > { %415 = vpow2.f32 %v257_v16 }
 0x18d   : > { %v416_v17 = vpop.eup %415 }
 0x18e   : > { %v259_v18 = vsel %vm252_vm2, %v416_v17, 0.0 }
 0x18f   : > { %260 = vadd.xlane.f32.xlu0 %v259_v18 }
 0x21c   : > { %v261_v19 = vpop.xlane.xlu0 %260 }
 0x21d   : > { %417 = vlog2.f32 %v261_v19 }
 0x227   : > { %v418_v20 = vpop.eup %417 }
 0x228   : > { %v263_v21 = vmul.f32 0.6931472, %v418_v20 }
 0x22a   : > { %v264_v22 = vsub.f32 %v256_v15, %v263_v21 }
 0x22c   : > { %265 = vst.msk [vmem:[%s161_s24] sm:$0xff] %vm252_vm2, %v264_v22 }
 0x22d   : > { %432 = shalt.err (!%p429_p3)
}
 0x22e   : > { %s433_s6 = scalar_lea.hbm %s582_s28, 128  ;;  %s437_s9 = scalar_lea.hbm %s628_s3, 256 }
 0x22f   : > { %p434_p4 = scmp.ne.s32.totalorder %s582_s28, %s433_s6  ;;  %p438_p9 = scmp.lt.u32.totalorder %s582_s28, %s628_s3 }
 0x230   : > { %p439_p10 = scmp.lt.u32.totalorder %s437_s9, %s433_s6  ;;  %p441_p12 = scmp.lt.u32.totalorder %s433_s6, %s582_s28 }
 0x231   : > { %p435_p7 = pnand %p434_p4, %p545_p5 }
 0x232   : > { %p440_p11 = por %p439_p10, %p438_p9 }
 0x233   : > { %p436_p8 = pneg %p435_p7 }
 0x234   : > { %p442_p13 = por %p441_p12, %p440_p11 }
 0x236   : > { %p443_p0 = pnand %p442_p13, %p436_p8 }
 0x238   : > { %446 = shalt.err (!%p443_p0)
}
 0x239   : > { %373 = dma.vmem_to_hbm [thread:$0]  (%p545_p5), %s584_s25, 128, %s582_s28, %s267_s29  }
 0x23a PF: > { %p379_p1 = scmp.ge.s32.totalorder %s481_s15, 2  ;;  %s292_s17 = sand.u32 1, %s469_s12  }
 0x23b   : > { %s293_s19 = scalar_lea.sflag [#allocation3], %s292_s17 }
 0x23c   : > { %p376_p2 = pnand %p379_p1, %p549_p6 }
 0x23e   : > { %464 = dma.done.wait (!%p376_p2), %s293_s19, 128  }
 0x23f   : > { %466 = vsyncadd (!%p376_p2), %s293_s19, 4294967168  ;;  %p13_p3 = scmp.ge.s32.totalorder %s532_s18, 4   ;;  %s631_s12 = smov %s473_s13 }
 0x240   : > { %s632_s13 = smov %s477_s14  ;;  %s633_s14 = smov %s543_s21 }
 0x241   : > { %s634_s15 = smov %s532_s18  ;;  %15 = sbr.rel (!%p13_p3) target bundleno = 3 (0x3), region = 67 }
 0x248   :  { %298 = vsyncpa [#allocation3], 1 }
 0x249   :  { %300 = vsyncpa [#allocation3 + $0x1], 1 }

</bundles_post_ra>
